<compile_context>
chip_gen: v7x
topology: tpu7x:2x2x1
jax: 0.10.0
libtpu: 0.0.40
codegen_flags: <defaults>
</compile_context>

<pallas_src>
import functools

import jax
import jax.numpy as jnp
from jax.experimental import pallas as pl
from jax.experimental.pallas import tpu as pltpu


# ---------------------------------------------------------------------------
# Kernel
# ---------------------------------------------------------------------------
def _pool_kernel(*refs, readout, tb):
    """One (graph-tile, hidden-tile) output block, accumulated over node tiles.

    refs (mean):  batch_ref [1,TN] i32, cnt_ref [TB,1] f32, x_ref [TN,TH],
                  o_ref [TB,TH], acc_ref [TB,TH] f32
    refs (other): batch_ref, x_ref, o_ref, acc_ref
    """
    if readout == "mean":
        batch_ref, cnt_ref, x_ref, o_ref, acc_ref = refs
    else:
        batch_ref, x_ref, o_ref, acc_ref = refs
        cnt_ref = None

    b_step = pl.program_id(0)
    n_step = pl.program_id(2)

    @pl.when(n_step == 0)
    def _init():
        if readout == "max":
            acc_ref[...] = jnp.full_like(acc_ref, -jnp.inf)
        else:
            acc_ref[...] = jnp.zeros_like(acc_ref)

    x = x_ref[...]                                   # [TN, TH], input dtype
    b = batch_ref[...]                               # [1, TN], int32
    tn = x.shape[0]

    # one_hot[g, n] = (batch[n] == global graph id of row g in this B tile)
    gid = jax.lax.broadcasted_iota(jnp.int32, (tb, tn), 0) + b_step * tb
    one_hot = gid == b                               # [TB, TN] bool

    if readout == "max":
        # Bounded (TB, TN, TH) temporary kept in the input dtype (bf16 VALUs
        # on v6e/v7x); only the reduced tile goes to the f32 accumulator.
        neg = jnp.asarray(-jnp.inf, dtype=x.dtype)
        masked = jnp.where(one_hot[:, :, None], x[None, :, :], neg)
        acc_ref[...] = jnp.maximum(acc_ref[...],
                                   jnp.max(masked, axis=1).astype(jnp.float32))
    else:
        # One-hot matmul on the MXU in the input dtype (0/1 exact in bf16),
        # f32 accumulation.  HIGHEST precision for f32 inputs keeps sums exact.
        oh = one_hot.astype(x.dtype)                 # [TB, TN]
        prec = jax.lax.Precision.HIGHEST if x.dtype == jnp.float32 else None
        acc_ref[...] += jnp.dot(oh, x,
                                preferred_element_type=jnp.float32,
                                precision=prec)

    @pl.when(n_step == pl.num_programs(2) - 1)
    def _finalize():
        res = acc_ref[...]
        if readout == "mean":
            # Exact divide, once per output block (off the critical path).
            res = res / jnp.maximum(cnt_ref[...], 1.0)
        o_ref[...] = res.astype(o_ref.dtype)


# ---------------------------------------------------------------------------
# Wrapper
# ---------------------------------------------------------------------------
def _round_up(v, m):
    return (v + m - 1) // m * m


def _pick_tile(padded, cap, base):
    """Largest multiple of `base` that divides `padded` and is <= cap."""
    t = max(base, min(padded, cap))
    t = (t // base) * base
    while padded % t:
        t -= base
    return t


def gnn_pool(x, batch, num_graphs: int, readout: str = "mean", *,
             node_tile: int = None, hidden_tile: int = None,
             graph_tile: int = None):
    """Pallas implementation of GNNPool.forward(x, batch)."""
    readout = readout.lower()
    if readout == "identity":
        return x  # pure passthrough, nothing to fuse
    if readout not in ("mean", "sum", "max"):
        raise ValueError(f"unknown readout: {readout}")

    n, h = x.shape
    dtype = x.dtype
    itemsize = jnp.dtype(dtype).itemsize

    # Pad to (8, 128)-aligned shapes; lane axes are multiples of 128.
    n_pad = _round_up(n, 128)
    h_pad = _round_up(h, 128)
    b_pad = _round_up(num_graphs, 8)

    if readout == "max":
        # Bound the (TB, TN, TH) masked temporary (~2 MiB f32 / larger for
        # bf16 where the temp is half the size).
        narrow = itemsize <= 2
        node_tile = node_tile if node_tile is not None else (512 if narrow else 256)
        hidden_tile = hidden_tile if hidden_tile is not None else 128
        graph_tile = graph_tile if graph_tile is not None else (32 if narrow else 16)
        tn = _pick_tile(n_pad, node_tile, 128)
        th = _pick_tile(h_pad, hidden_tile, 128)
        tb = _pick_tile(b_pad, graph_tile, 8)
    else:
        # sum / mean
        node_tile = node_tile if node_tile is not None else 1024
        tn = _pick_tile(n_pad, node_tile, 128)

        if hidden_tile is not None:
            th = _pick_tile(h_pad, hidden_tile, 128)
        else:
            # Full hidden per block when small, but keep >=2 hidden blocks so
            # a "parallel" axis with multiple blocks exists for v7x megacore.
            th = _pick_tile(h_pad, 512, 128)
            if h_pad // th < 2 and h_pad >= 256:
                th = _pick_tile(h_pad, max(128, h_pad // 2), 128)

        if graph_tile is not None:
            tb = _pick_tile(b_pad, graph_tile, 8)
        else:
            # Collapse the graph axis (single block) so x is streamed from HBM
            # exactly once -- the dominant win for this memory-bound kernel --
            # unless the resident accumulator + double-buffered output block
            # would use too much VMEM.
            if b_pad * th * (4 + 2 * itemsize) <= 12 * 2**20:
                tb = b_pad
            else:
                tb = _pick_tile(b_pad, 512, 8)   # still >=256 MXU rows if possible

    # Padded nodes get batch id -1 (matches no graph) and zero features.
    x_p = jnp.zeros((n_pad, h_pad), dtype).at[:n, :h].set(x)
    batch_p = jnp.full((1, n_pad), -1, jnp.int32).at[0, :n].set(
        batch.astype(jnp.int32))

    grid = (b_pad // tb, h_pad // th, n_pad // tn)

    in_specs = [pl.BlockSpec((1, tn), lambda b, hh, nn: (0, nn))]   # batch ids
    operands = [batch_p]
    if readout == "mean":
        # Counts depend only on `batch`: compute once in the wrapper and pass
        # as a tiny (B, 1) input instead of re-reducing per tile in-kernel.
        counts = jax.ops.segment_sum(jnp.ones((n,), jnp.float32),
                                     batch.astype(jnp.int32),
                                     num_segments=num_graphs)
        cnt_p = jnp.zeros((b_pad, 1), jnp.float32).at[:num_graphs, 0].set(counts)
        in_specs.append(pl.BlockSpec((tb, 1), lambda b, hh, nn: (b, 0)))
        operands.append(cnt_p)
    in_specs.append(pl.BlockSpec((tn, th), lambda b, hh, nn: (nn, hh)))  # x tile
    operands.append(x_p)

    # Explicit VMEM budget from the chosen tiles (double-buffered I/O +
    # scratch) with headroom; capped at 48 MiB (safe on v7x's 64 MiB).
    est = 2 * tn * th * itemsize           # x, double-buffered
    est += 2 * 8 * tn * 4                  # batch row (sublane-padded), 2 bufs
    est += 2 * tb * th * itemsize          # output, double-buffered
    est += tb * th * 4                     # f32 accumulator scratch
    if readout == "mean":
        est += 2 * tb * 128 * 4            # counts (lane-padded), 2 bufs
    if readout == "max":
        est += tb * tn * th * itemsize     # masked 3-D temporary
    vmem_limit = int(min(48 * 2**20, max(16 * 2**20, 2 * est)))

    kernel = functools.partial(_pool_kernel, readout=readout, tb=tb)

    out = pl.pallas_call(
        kernel,
        out_shape=jax.ShapeDtypeStruct((b_pad, h_pad), dtype),
        grid=grid,
        in_specs=in_specs,
        out_specs=pl.BlockSpec((tb, th), lambda b, hh, nn: (b, hh)),
        scratch_shapes=[
            pltpu.VMEM((tb, th), jnp.float32),   # sum / max accumulator
        ],
        compiler_params=pltpu.CompilerParams(
            dimension_semantics=("parallel", "parallel", "arbitrary"),
            vmem_limit_bytes=vmem_limit),
    )(*operands)

    return out[:num_graphs, :h]


# ---------------------------------------------------------------------------
# Pure-JAX reference
# ---------------------------------------------------------------------------
def _reference_pool(x, batch, num_graphs, readout):
    readout = readout.lower()
    if readout == "identity":
        return x
    seg_sum = jax.ops.segment_sum(x, batch, num_segments=num_graphs)
    if readout == "sum":
        return seg_sum
    if readout == "mean":
        counts = jax.ops.segment_sum(jnp.ones((x.shape[0],), x.dtype), batch,
                                     num_segments=num_graphs)
        return seg_sum / jnp.maximum(counts, 1.0)[:, None]
    if readout == "max":
        return jax.ops.segment_max(x, batch, num_segments=num_graphs)
    raise ValueError(readout)


# ---------------------------------------------------------------------------
# Demo / self-test
# ---------------------------------------------------------------------------
if __name__ == "__main__":
    key = jax.random.PRNGKey(0)
    ok = True

    configs = [
        # Tiny shapes (single grid step, graph axis fully collapsed).
        dict(num_nodes=16, hidden=32, num_graphs=2, tiles={}),
        # Multi-tile config exercising accumulation over node tiles, multiple
        # hidden blocks, and the tiled-graph fallback (grid = (2, 2, 3)).
        dict(num_nodes=300, hidden=160, num_graphs=10,
             tiles=dict(node_tile=128, hidden_tile=128, graph_tile=8)),
    ]

    for cfg in configs:
        n, h, g = cfg["num_nodes"], cfg["hidden"], cfg["num_graphs"]
        kx, kb = jax.random.split(jax.random.fold_in(key, n))
        x = jax.random.normal(kx, (n, h), dtype=jnp.float32)
        # PyG-style contiguous batching; every graph gets at least one node.
        ids = jnp.concatenate([
            jnp.arange(g, dtype=jnp.int32),
            jax.random.randint(kb, (n - g,), 0, g, dtype=jnp.int32),
        ])
        batch = jnp.sort(ids)

        for readout in ("mean", "sum", "max", "identity"):
            out = gnn_pool(x, batch, g, readout=readout, **cfg["tiles"])
            out = jax.block_until_ready(out)
            ref = _reference_pool(x, batch, g, readout)
            if not jnp.allclose(out, ref, atol=1e-4, rtol=1e-4):
                ok = False
                err = float(jnp.max(jnp.abs(out - ref)))
                print(f"MISMATCH readout={readout} n={n} h={h} g={g} "
                      f"max_err={err}")

    if ok:
        print("KERNEL_OK")
</pallas_src>

<mosaic_0001>
module attributes {stable_mosaic.version = 11 : i64} {
  func.func @_pool_kernel(%arg0: i32, %arg1: i32, %arg2: i32, %arg3: memref<1x128xi32, #tpu.memory_space<vmem>>, %arg4: memref<8x1xf32, #tpu.memory_space<vmem>>, %arg5: memref<128x128xf32, #tpu.memory_space<vmem>>, %arg6: memref<8x128xf32, #tpu.memory_space<vmem>>, %arg7: memref<8x128xf32, #tpu.memory_space<vmem>>) attributes {dimension_semantics = [#tpu.dimension_semantics<parallel>, #tpu.dimension_semantics<parallel>, #tpu.dimension_semantics<arbitrary>], iteration_bounds = array<i64: 1, 1, 1>, scalar_prefetch = 0 : i64, scratch_operands = 1 : i64, tpu.core_type = #tpu.core_type<tc>, window_params = [{transform_indices = @transform_0, window_bounds = array<i64: 1, 128>}, {transform_indices = @transform_1, window_bounds = array<i64: 8, 1>}, {transform_indices = @transform_2, window_bounds = array<i64: 128, 128>}, {transform_indices = @transform_3, window_bounds = array<i64: 8, 128>}]} {
    %c0_i32 = arith.constant 0 : i32
    %0 = arith.cmpi eq, %arg2, %c0_i32 : i32
    %1 = arith.extui %0 : i1 to i32
    %c0_i32_0 = arith.constant 0 : i32
    %2 = arith.cmpi ne, %1, %c0_i32_0 : i32
    scf.if %2 {
      %cst_10 = arith.constant 0.000000e+00 : f32
      %20 = vector.broadcast %cst_10 : f32 to vector<8x128xf32>
      %c0_11 = arith.constant 0 : index
      %c0_12 = arith.constant 0 : index
      %21 = vector.load %arg7[%c0_11, %c0_12] : memref<8x128xf32, #tpu.memory_space<vmem>>, vector<8x128xf32>
      tpu.vector_store %arg7[%c0_11, %c0_12], %20 {strides = array<i32>} : memref<8x128xf32, #tpu.memory_space<vmem>>, vector<8x128xf32>,
    } else {
    }
    %c0 = arith.constant 0 : index
    %c0_1 = arith.constant 0 : index
    %3 = vector.load %arg5[%c0, %c0_1] : memref<128x128xf32, #tpu.memory_space<vmem>>, vector<128x128xf32>
    %c0_2 = arith.constant 0 : index
    %c0_3 = arith.constant 0 : index
    %4 = vector.load %arg3[%c0_2, %c0_3] : memref<1x128xi32, #tpu.memory_space<vmem>>, vector<1x128xi32>
    %5 = tpu.iota {dimensions = array<i32: 0>} : vector<8x128xi32>
    %c8_i32 = arith.constant 8 : i32
    %6 = arith.muli %arg0, %c8_i32 : i32
    %7 = vector.broadcast %6 : i32 to vector<8x128xi32>
    %8 = arith.addi %5, %7 : vector<8x128xi32>
    %9 = vector.broadcast %4 : vector<1x128xi32> to vector<8x128xi32>
    %10 = arith.cmpi eq, %8, %9 : vector<8x128xi32>
    %11 = arith.extui %10 : vector<8x128xi1> to vector<8x128xi32>
    %12 = arith.sitofp %11 : vector<8x128xi32> to vector<8x128xf32>
    %c0_4 = arith.constant 0 : index
    %c0_5 = arith.constant 0 : index
    %13 = vector.load %arg7[%c0_4, %c0_5] : memref<8x128xf32, #tpu.memory_space<vmem>>, vector<8x128xf32>
    %cst = arith.constant dense<0.000000e+00> : vector<8x128xf32>
    %14 = tpu.matmul %12, %3, %cst {dimension_numbers = #tpu.dot_dimension_numbers<[1], [0], [0], [1], [0, 0, 1, 1], [], []>, precision = #tpu.contract_precision<fp32>} : vector<8x128xf32>, vector<128x128xf32>, vector<8x128xf32> -> vector<8x128xf32>
    %15 = arith.addf %13, %14 : vector<8x128xf32>
    %c0_6 = arith.constant 0 : index
    %c0_7 = arith.constant 0 : index
    %16 = vector.load %arg7[%c0_6, %c0_7] : memref<8x128xf32, #tpu.memory_space<vmem>>, vector<8x128xf32>
    tpu.vector_store %arg7[%c0_6, %c0_7], %15 {strides = array<i32>} : memref<8x128xf32, #tpu.memory_space<vmem>>, vector<8x128xf32>,
    %c0_i32_8 = arith.constant 0 : i32
    %17 = arith.cmpi eq, %arg2, %c0_i32_8 : i32
    %18 = arith.extui %17 : i1 to i32
    %c0_i32_9 = arith.constant 0 : i32
    %19 = arith.cmpi ne, %18, %c0_i32_9 : i32
    scf.if %19 {
      %c0_10 = arith.constant 0 : index
      %c0_11 = arith.constant 0 : index
      %20 = vector.load %arg7[%c0_10, %c0_11] : memref<8x128xf32, #tpu.memory_space<vmem>>, vector<8x128xf32>
      %c0_12 = arith.constant 0 : index
      %c0_13 = arith.constant 0 : index
      %21 = vector.load %arg4[%c0_12, %c0_13] : memref<8x1xf32, #tpu.memory_space<vmem>>, vector<8x1xf32>
      %cst_14 = arith.constant 1.000000e+00 : f32
      %22 = vector.broadcast %cst_14 : f32 to vector<8x1xf32>
      %23 = arith.maximumf %21, %22 : vector<8x1xf32>
      %24 = vector.broadcast %23 : vector<8x1xf32> to vector<8x128xf32>
      %25 = arith.divf %20, %24 : vector<8x128xf32>
      %c0_15 = arith.constant 0 : index
      %c0_16 = arith.constant 0 : index
      %26 = vector.load %arg6[%c0_15, %c0_16] : memref<8x128xf32, #tpu.memory_space<vmem>>, vector<8x128xf32>
      tpu.vector_store %arg6[%c0_15, %c0_16], %25 {strides = array<i32>} : memref<8x128xf32, #tpu.memory_space<vmem>>, vector<8x128xf32>,
    } else {
    }
    return
  }
  func.func @transform_0(%arg0: i32, %arg1: i32, %arg2: i32) -> (i32, i32) {
    %c0_i32 = arith.constant 0 : i32
    %c0_i32_0 = arith.constant 0 : i32
    return %c0_i32, %arg2 : i32, i32
  }
  func.func @transform_1(%arg0: i32, %arg1: i32, %arg2: i32) -> (i32, i32) {
    %c0_i32 = arith.constant 0 : i32
    %c0_i32_0 = arith.constant 0 : i32
    return %arg0, %c0_i32 : i32, i32
  }
  func.func @transform_2(%arg0: i32, %arg1: i32, %arg2: i32) -> (i32, i32) {
    %c0_i32 = arith.constant 0 : i32
    return %arg2, %arg1 : i32, i32
  }
  func.func @transform_3(%arg0: i32, %arg1: i32, %arg2: i32) -> (i32, i32) {
    %c0_i32 = arith.constant 0 : i32
    return %arg0, %arg1 : i32, i32
  }
}

</mosaic_0001>

<bundles_post_ra>
// kernel: tpu_custom_call.1
= control target key start
LH: loop header
LB: loop body
LE: loop exit
PB: predicated region body
PF: predicated region fallthrough
CT: control target
= control target key end

     0   :  { %8 = vsyncpa [#allocation4], 0  ;;  %s1601_s0 = inlined_call_operand.vmem [shape: s32[1,128], index: 0, kind: input, shape index: {}]   ;;  %s1602_s1 = inlined_call_operand.vmem [shape: f32[8,1], index: 1, kind: input, shape index: {}]   ;;  %s1603_s2 = inlined_call_operand.hbm [shape: f32[128,128], index: 2, kind: input, shape index: {}]   ;;  %s1604_s3 = inlined_call_operand.hbm [shape: f32[8,128], index: 3, kind: output, shape index: {}]  }
   0x1   :  { %9 = vsyncpa [#allocation5], 0  ;;  %s1266_s12 = smov [#allocation3]   ;;  %s1218_s16 = scalar_lea.hbm %s1603_s2, 2048 }
   0x2   :  { %s19_s13 = sshll.u32 %s1266_s12, 4  ;;  %p1219_p0 = scmp.ne.s32.totalorder %s1603_s2, %s1218_s16  ;;  %s20_s13 = int_to_ptr.vmem [resolvable:$true] %s19_s13 }
   0x3   :  { %p1222_p1 = scmp.lt.u32.totalorder %s1218_s16, %s1603_s2 }
   0x5   :  { %p1224_p2 = pnand %p1222_p1, %p1219_p0 }
   0x7   :  { %1227 = shalt.err (!%p1224_p2)
}
   0x8   :  { %s1228_s21 = scalar_lea.vmem %s20_s13, 2048  ;;  %p1233_p4 = scmp.lt.s32.totalorder %s20_s13, %s20_s13 }
   0x9   :  { %p1229_p3 = scmp.ne.s32.totalorder %s20_s13, %s1228_s21  ;;  %p1234_p5 = scmp.lt.s32.totalorder %s1228_s21, %s1228_s21 }
   0xb   :  { %p1235_p6 = por %p1234_p5, %p1233_p4 }
   0xd   :  { %p1236_p7 = pnand %p1235_p6, %p1229_p3 }
   0xf   :  { %1239 = shalt.err (!%p1236_p7)
}
  0x10   :  { %s1267_s22 = smov 128   ;;  %s1268_s23 = smov 8  }
  0x11   :  { %25 = dma.hbm_to_vmem [thread:$0]  %s1603_s2, 2048, %s20_s13, [#allocation4], %s1267_s22, %s1267_s22, %s1268_s23  }
  0x12   :  { %1262 = dma.done.wait [#allocation4], 2048  }
  0x13   :  { %1263 = vsyncadd [#allocation4], 4294965248  ;;  %v1269_v0 = vmov 0.0|0.0   ;;  %vm1270_vm0 = vmmov 0   ;;  %v1271_v1 = vmov 0.0   ;;  %v1272_v2 = vmov 0  }
  0x14   :  { %1053 = vmatprep.subr.bf16.mxu1 %v1269_v0  ;;  %1125 = vmatprep.subr.bf16.mxu0 %v1269_v0  ;;  %v34_v3 = vld [vmem:[#allocation3] sm:$0xff]  ;;  %v35_v4 = vld [vmem:[#allocation3 + $0x8] sm:$0xff]  ;;  %v36_v5 = vld [vmem:[#allocation3 + $0x10] sm:$0xff]  ;;  %v51_v19 = vlaneseq }
  0x15   :  { %875 = vmatprep.mubr.msk.f32.mxu1 %vm1270_vm0, %v1271_v1  ;;  %980 = vmatprep.mubr.msk.f32.mxu0 %vm1270_vm0, %v1271_v1  ;;  %v65_v6 = vand.u32 4294901760, %v34_v3  ;;  %v68_v7 = vand.u32 4294901760, %v35_v4  ;;  %v37_v8 = vld [vmem:[#allocation3 + $0x18] sm:$0xff]  ;;  %v71_v9 = vand.u32 4294901760, %v36_v5  ;;  %v38_v11 = vld [vmem:[#allocation3 + $0x20] sm:$0xff]  ;;  %v39_v12 = vld [vmem:[#allocation3 + $0x28] sm:$0xff] }
  0x16   :  { %1215 = vset.pattern.permute.xlu0 %v1272_v2  ;;  %v74_v10 = vand.u32 4294901760, %v37_v8  ;;  %v77_v15 = vand.u32 4294901760, %v38_v11  ;;  %v80_v16 = vand.u32 4294901760, %v39_v12  ;;  %v1321_v17 = vld [vmem:[#allocation3 + $0x30] sm:$0xff]  ;;  %v1323_v18 = vld [vmem:[#allocation3 + $0x38] sm:$0xff]  ;;  %v1333_v23 = vld [vmem:[#allocation3 + $0x40] sm:$0xff] }
  0x17   :  { %v1313_v13 = vpack.c.bf16 %v68_v7, %v65_v6  ;;  %v83_v21 = vand.u32 4294901760, %v1321_v17  ;;  %v86_v22 = vand.u32 4294901760, %v1323_v18  ;;  %v1335_v24 = vld [vmem:[#allocation3 + $0x48] sm:$0xff]  ;;  %v1337_v25 = vshrl.u32 %v51_v19, 7  ;;  %v1342_v26 = vld [vmem:[%s1601_s0] ss:$0 sm:$0xff] }
  0x18   :  { %v1317_v14 = vpack.c.bf16 %v74_v10, %v71_v9  ;;  %v1327_v20 = vpack.c.bf16 %v80_v16, %v77_v15  ;;  %v89_v28 = vand.u32 4294901760, %v1333_v23  ;;  %v92_v29 = vand.u32 4294901760, %v1335_v24  ;;  %v1352_v30 = vld [vmem:[#allocation3 + $0x50] sm:$0xff]  ;;  %v1354_v31 = vld [vmem:[#allocation3 + $0x58] sm:$0xff]  ;;  %v1378_v38 = vld [vmem:[#allocation3 + $0x60] sm:$0xff] }
  0x19   :  { %1055 = vmatpush3.bf16.msra.mxu1 %v1313_v13  ;;  %1127 = vmatpush3.bf16.msra.mxu0 %v1313_v13  ;;  %v1346_v27 = vpack.c.bf16 %v86_v22, %v83_v21  ;;  %vm60_vm1 = vcmp.eq.s32.totalorder %v1337_v25, %v1342_v26  ;;  %v1358_v32 = vsub.f32 %v34_v3, %v65_v6  ;;  %v95_v35 = vand.u32 4294901760, %v1352_v30  ;;  %v1380_v39 = vld [vmem:[#allocation3 + $0x68] sm:$0xff]  ;;  %v1400_v48 = vld [vmem:[#allocation3 + $0x70] sm:$0xff]  ;;  %v1404_v49 = vld [vmem:[#allocation3 + $0x78] sm:$0xff] }
  0x1a   :  { %1056 = vmatprep.subr.bf16.mxu1 %v1269_v0  ;;  %1128 = vmatprep.subr.bf16.mxu0 %v1269_v0  ;;  %v1360_v33 = vsub.f32 %v35_v4, %v68_v7  ;;  %v1368_v34 = vpack.c.bf16 %v92_v29, %v89_v28  ;;  %v98_v36 = vand.u32 4294901760, %v1354_v31  ;;  %v737_v37 = vsel %vm60_vm1, 1.0, %v1271_v1  ;;  %v711_v63 = vld [vmem:[%s1602_s1] sm:$0xff]  ;;  %s1274_s1 = smov [#allocation6]  }
  0x1b   :  { %v158_v40 = vand.u32 4294901760, %v1358_v32  ;;  %v1383_v41 = vsub.f32 %v36_v5, %v71_v9  ;;  %v1385_v42 = vsub.f32 %v737_v37, %v737_v37  ;;  %v1388_v44 = vsub.f32 %v37_v8, %v74_v10  ;;  %s727_s28 = sshll.u32 %s1274_s1, 4  ;;  %s728_s28 = int_to_ptr.vmem [resolvable:$true] %s727_s28 }
  0x1c   :  { %v165_v43 = vand.u32 4294901760, %v1360_v33  ;;  %v1396_v45 = vpack.c.bf16 %v98_v36, %v95_v35  ;;  %v101_v46 = vand.u32 4294901760, %v1378_v38  ;;  %v104_v47 = vand.u32 4294901760, %v1380_v39  ;;  %s1240_s29 = scalar_lea.vmem %s728_s28, 128  ;;  %p1245_p9 = scmp.lt.s32.totalorder %s728_s28, %s728_s28 }
  0x1d   :  { %1058 = vmatpush3.bf16.msra.mxu1 %v1317_v14  ;;  %1130 = vmatpush3.bf16.msra.mxu0 %v1317_v14  ;;  %v1406_v50 = vsub.f32 %v38_v11, %v77_v15  ;;  %v159_v51 = vsub.f32 %v1358_v32, %v158_v40  ;;  %v1409_v52 = vsub.f32 %v39_v12, %v80_v16  ;;  %v107_v53 = vand.u32 4294901760, %v1400_v48  ;;  %p1241_p8 = scmp.ne.s32.totalorder %s728_s28, %s1240_s29  ;;  %p1246_p10 = scmp.lt.s32.totalorder %s1240_s29, %s1240_s29 }
  0x1e   :  { %1059 = vmatprep.subr.bf16.mxu1 %v1269_v0  ;;  %1131 = vmatprep.subr.bf16.mxu0 %v1269_v0  ;;  %v147_v54 = vand.u32 4294901760, %v1385_v42  ;;  %v166_v55 = vsub.f32 %v1360_v33, %v165_v43  ;;  %v1420_v56 = vpack.c.bf16 %v104_v47, %v101_v46  ;;  %v110_v57 = vand.u32 4294901760, %v1404_v49 }
  0x1f   :  { %v172_v58 = vand.u32 4294901760, %v1383_v41  ;;  %v179_v59 = vand.u32 4294901760, %v1388_v44  ;;  %v1428_v60 = vsub.f32 %v1321_v17, %v83_v21  ;;  %v1431_v61 = vsub.f32 %v1323_v18, %v86_v22  ;;  %p1247_p11 = por %p1246_p10, %p1245_p9 }
  0x20   :  { %v160_v62 = vand.u32 4294901760, %v159_v51  ;;  %v148_v2 = vsub.f32 %v1385_v42, %v147_v54  ;;  %v167_v3 = vand.u32 4294901760, %v166_v55  ;;  %v186_v4 = vand.u32 4294901760, %v1406_v50 }
  0x21   :  { %1061 = vmatpush3.bf16.msra.mxu1 %v1327_v20  ;;  %1133 = vmatpush3.bf16.msra.mxu0 %v1327_v20  ;;  %v193_v5 = vand.u32 4294901760, %v1409_v52  ;;  %v1445_v6 = vpack.c.bf16 %v110_v57, %v107_v53  ;;  %v173_v7 = vsub.f32 %v1383_v41, %v172_v58  ;;  %v180_v8 = vsub.f32 %v1388_v44, %v179_v59  ;;  %p1248_p12 = pnand %p1247_p11, %p1241_p8 }
  0x22   :  { %1062 = vmatprep.subr.bf16.mxu1 %v1269_v0  ;;  %1134 = vmatprep.subr.bf16.mxu0 %v1269_v0  ;;  %v712_v9 = vmax.f32 %v711_v63, 1.0  ;;  %v1454_v10 = vsub.f32 %v1333_v23, %v89_v28  ;;  %v1459_v11 = vsub.f32 %v1335_v24, %v92_v29  ;;  %v1150_v12 = vpack.c.bf16 %v165_v43, %v158_v40 }
  0x23   :  { %v149_v15 = vand.u32 4294901760, %v148_v2  ;;  %v1078_v16 = vpack.c.bf16 %v167_v3, %v160_v62  ;;  %v187_v17 = vsub.f32 %v1406_v50, %v186_v4  ;;  %v194_v18 = vsub.f32 %v1409_v52, %v193_v5 }
  0x24   :  { %715 = vperm.xlu0 %1215, %v712_v9   ;;  %v174_v19 = vand.u32 4294901760, %v173_v7  ;;  %v181_v21 = vand.u32 4294901760, %v180_v8  ;;  %v200_v22 = vand.u32 4294901760, %v1428_v60  ;;  %v207_v23 = vand.u32 4294901760, %v1431_v61 }
  0x25   :  { %1064 = vmatpush3.bf16.msra.mxu1 %v1346_v27  ;;  %1136 = vmatpush3.bf16.msra.mxu0 %v1346_v27  ;;  %v1472_v24 = vsub.f32 %v1352_v30, %v95_v35  ;;  %v1477_v28 = vsub.f32 %v1354_v31, %v98_v36  ;;  %v1153_v29 = vpack.c.bf16 %v179_v59, %v172_v58  ;;  %v188_v37 = vand.u32 4294901760, %v187_v17 }
  0x26   :  { %1065 = vmatprep.subr.bf16.mxu1 %v1269_v0  ;;  %1137 = vmatprep.subr.bf16.mxu0 %v1269_v0  ;;  %v214_v40 = vand.u32 4294901760, %v1454_v10  ;;  %v221_v43 = vand.u32 4294901760, %v1459_v11  ;;  %v1081_v51 = vpack.c.bf16 %v181_v21, %v174_v19  ;;  %v195_v55 = vand.u32 4294901760, %v194_v18 }
  0x27   :  { %v201_v30 = vsub.f32 %v1428_v60, %v200_v22  ;;  %v208_v35 = vsub.f32 %v1431_v61, %v207_v23  ;;  %v1488_v31 = vsub.f32 %v1378_v38, %v101_v46  ;;  %v1493_v36 = vsub.f32 %v1380_v39, %v104_v47 }
  0x28   :  { %v215_v58 = vsub.f32 %v1454_v10, %v214_v40  ;;  %v222_v59 = vsub.f32 %v1459_v11, %v221_v43  ;;  %v228_v62 = vand.u32 4294901760, %v1472_v24  ;;  %v1084_v38 = vpack.c.bf16 %v195_v55, %v188_v37 }
  0x29   :  { %1067 = vmatpush3.bf16.msra.mxu1 %v1368_v34  ;;  %1139 = vmatpush3.bf16.msra.mxu0 %v1368_v34  ;;  %v202_v46 = vand.u32 4294901760, %v201_v30  ;;  %v209_v63 = vand.u32 4294901760, %v208_v35  ;;  %v235_v39 = vand.u32 4294901760, %v1477_v28  ;;  %v1508_v47 = vsub.f32 %v1400_v48, %v107_v53 }
  0x2a   :  { %1068 = vmatprep.subr.bf16.mxu1 %v1269_v0  ;;  %1140 = vmatprep.subr.bf16.mxu0 %v1269_v0  ;;  %v1513_v2 = vsub.f32 %v1404_v49, %v110_v57  ;;  %v1159_v3 = vpack.c.bf16 %v207_v23, %v200_v22  ;;  %v229_v7 = vsub.f32 %v1472_v24, %v228_v62  ;;  %v249_v48 = vand.u32 4294901760, %v1493_v36 }
  0x2b   :  { %v1087_v8 = vpack.c.bf16 %v209_v63, %v202_v46  ;;  %v236_v9 = vsub.f32 %v1477_v28, %v235_v39  ;;  %v1162_v53 = vpack.c.bf16 %v221_v43, %v214_v40  ;;  %v1165_v21 = vpack.c.bf16 %v235_v39, %v228_v62 }
  0x2c   :  { %v230_v57 = vand.u32 4294901760, %v229_v7  ;;  %v250_v18 = vsub.f32 %v1493_v36, %v249_v48  ;;  %v263_v19 = vand.u32 4294901760, %v1513_v2  ;;  %v1105_v62 = vpack.c.bf16 %v1388_v44, %v1383_v41 }
  0x2d   :  { %1070 = vmatpush3.bf16.msra.mxu1 %v1396_v45  ;;  %1142 = vmatpush3.bf16.msra.mxu0 %v1396_v45 }
  0x2e   :  { %1071 = vmatprep.subr.bf16.mxu1 %v1269_v0  ;;  %1143 = vmatprep.subr.bf16.mxu0 %v1269_v0  ;;  %v251_v37 = vand.u32 4294901760, %v250_v18  ;;  %v264_v40 = vsub.f32 %v1513_v2, %v263_v19 }
  0x30   :  { %v265_v30 = vand.u32 4294901760, %v264_v40 }
  0x31   :  { %1073 = vmatpush3.bf16.msra.mxu1 %v1420_v56  ;;  %1145 = vmatpush3.bf16.msra.mxu0 %v1420_v56 }
  0x32   :  { %1074 = vmatprep.subr.bf16.mxu1 %v1269_v0  ;;  %1146 = vmatprep.subr.bf16.mxu0 %v1269_v0 }
  0x35   :  { %1076 = vmatpush3.bf16.msra.mxu1 %v1445_v6  ;;  %1148 = vmatpush3.bf16.msra.mxu0 %v1445_v6 }
  0x36   :  { %1077 = vmatprep.subr.bf16.mxu1 %v1269_v0  ;;  %1149 = vmatprep.subr.bf16.mxu0 %v1269_v0 }
  0x38   :  { %876 = vmatmul.mubr.f32.vlgmr.msra.gmra.mrb[0].mxu1 %v149_v15  ;;  %981 = vmatmul.mubr.f32.vlgmr.msra.gmra.mrb[0].mxu0 %v147_v54  ;;  %v1156_v54 = vpack.c.bf16 %v193_v5, %v186_v4  ;;  %v216_v4 = vand.u32 4294901760, %v215_v58  ;;  %v223_v5 = vand.u32 4294901760, %v222_v59  ;;  %v256_v15 = vand.u32 4294901760, %v1508_v47 }
  0x39   :  { %1079 = vmatpush3.bf16.msra.mxu1 %v1078_v16  ;;  %1151 = vmatpush3.bf16.msra.mxu0 %v1150_v12  ;;  %v242_v12 = vand.u32 4294901760, %v1488_v31  ;;  %v237_v16 = vand.u32 4294901760, %v236_v9  ;;  %v1102_v58 = vpack.c.bf16 %v1360_v33, %v1358_v32  ;;  %v1273_v59 = vmov 1.0  }
  0x3a   :  { %1080 = vmatprep.subr.bf16.mxu1 %v1269_v0  ;;  %1152 = vmatprep.subr.bf16.mxu0 %v1269_v0  ;;  %v1090_v49 = vpack.c.bf16 %v223_v5, %v216_v4  ;;  %v257_v22 = vsub.f32 %v1508_v47, %v256_v15  ;;  %v1108_v32 = vpack.c.bf16 %v1409_v52, %v1406_v50 }
  0x3b   :  { %910 = vmatprep.mubr.msk.f32.mxu1 %vm1270_vm0, %v1271_v1  ;;  %1015 = vmatprep.mubr.msk.f32.mxu0 %vm1270_vm0, %v1271_v1  ;;  %v243_v17 = vsub.f32 %v1488_v31, %v242_v12  ;;  %v1093_v23 = vpack.c.bf16 %v237_v16, %v230_v57 }
  0x3c   :  { %v258_v55 = vand.u32 4294901760, %v257_v22 }
  0x3d   :  { %1082 = vmatpush3.bf16.msra.mxu1 %v1081_v51  ;;  %1154 = vmatpush3.bf16.msra.mxu0 %v1153_v29  ;;  %v244_v29 = vand.u32 4294901760, %v243_v17  ;;  %v1168_v51 = vpack.c.bf16 %v249_v48, %v242_v12 }
  0x3e   :  { %1083 = vmatprep.subr.bf16.mxu1 %v1269_v0  ;;  %1155 = vmatprep.subr.bf16.mxu0 %v1269_v0  ;;  %v1099_v35 = vpack.c.bf16 %v265_v30, %v258_v55 }
  0x3f   :  { %v1096_v43 = vpack.c.bf16 %v251_v37, %v244_v29 }
  0x41   :  { %1085 = vmatpush3.bf16.msra.mxu1 %v1084_v38  ;;  %1157 = vmatpush3.bf16.msra.mxu0 %v1156_v54  ;;  %v1171_v54 = vpack.c.bf16 %v263_v19, %v256_v15 }
  0x42   :  { %1086 = vmatprep.subr.bf16.mxu1 %v1269_v0  ;;  %1158 = vmatprep.subr.bf16.mxu0 %v1269_v0 }
  0x45   :  { %1088 = vmatpush3.bf16.msra.mxu1 %v1087_v8  ;;  %1160 = vmatpush3.bf16.msra.mxu0 %v1159_v3 }
  0x46   :  { %1089 = vmatprep.subr.bf16.mxu1 %v1269_v0  ;;  %1161 = vmatprep.subr.bf16.mxu0 %v1269_v0 }
  0x49   :  { %1091 = vmatpush3.bf16.msra.mxu1 %v1090_v49  ;;  %1163 = vmatpush3.bf16.msra.mxu0 %v1162_v53 }
  0x4a   :  { %1092 = vmatprep.subr.bf16.mxu1 %v1269_v0  ;;  %1164 = vmatprep.subr.bf16.mxu0 %v1269_v0 }
  0x4d   :  { %1094 = vmatpush3.bf16.msra.mxu1 %v1093_v23  ;;  %1166 = vmatpush3.bf16.msra.mxu0 %v1165_v21 }
  0x4e   :  { %1095 = vmatprep.subr.bf16.mxu1 %v1269_v0  ;;  %1167 = vmatprep.subr.bf16.mxu0 %v1269_v0 }
  0x51   :  { %1097 = vmatpush3.bf16.msra.mxu1 %v1096_v43  ;;  %1169 = vmatpush3.bf16.msra.mxu0 %v1168_v51 }
  0x52   :  { %1098 = vmatprep.subr.bf16.mxu1 %v1269_v0  ;;  %1170 = vmatprep.subr.bf16.mxu0 %v1269_v0 }
  0x55   :  { %1100 = vmatpush3.bf16.msra.mxu1 %v1099_v35  ;;  %1172 = vmatpush3.bf16.msra.mxu0 %v1171_v54 }
  0x56   :  { %1101 = vmatprep.subr.bf16.mxu1 %v1269_v0  ;;  %1173 = vmatprep.subr.bf16.mxu0 %v1269_v0 }
  0x58   :  { %911 = vmatmul.mubr.msk.f32.vlgmr.msra.gmra.mrb[0].mxu1 %vm60_vm1, %v1273_v59  ;;  %1016 = vmatmul.mubr.msk.f32.vlgmr.msra.gmra.mrb[0].mxu0 %vm60_vm1, %v1273_v59 }
  0x59   :  { %1103 = vmatpush3.bf16.msra.mxu1 %v1102_v58  ;;  %1175 = vmatpush3.bf16.msra.mxu0 %v1313_v13  ;;  %v1111_v13 = vpack.c.bf16 %v1431_v61, %v1428_v60 }
  0x5a   :  { %1104 = vmatprep.subr.bf16.mxu1 %v1269_v0  ;;  %1176 = vmatprep.subr.bf16.mxu0 %v1269_v0 }
  0x5b   :  { %945 = vmatprep.mubr.msk.f32.mxu1 %vm1270_vm0, %v1271_v1  ;;  %1050 = vmatprep.mubr.msk.f32.mxu0 %vm1270_vm0, %v1271_v1  ;;  %v1114_v1 = vpack.c.bf16 %v1459_v11, %v1454_v10 }
  0x5d   :  { %1106 = vmatpush3.bf16.msra.mxu1 %v1105_v62  ;;  %1178 = vmatpush3.bf16.msra.mxu0 %v1317_v14  ;;  %v1117_v14 = vpack.c.bf16 %v1477_v28, %v1472_v24 }
  0x5e   :  { %1107 = vmatprep.subr.bf16.mxu1 %v1269_v0  ;;  %1179 = vmatprep.subr.bf16.mxu0 %v1269_v0 }
  0x61   :  { %1109 = vmatpush3.bf16.msra.mxu1 %v1108_v32  ;;  %1181 = vmatpush3.bf16.msra.mxu0 %v1327_v20  ;;  %v1120_v20 = vpack.c.bf16 %v1493_v36, %v1488_v31 }
  0x62   :  { %1110 = vmatprep.subr.bf16.mxu1 %v1269_v0  ;;  %1182 = vmatprep.subr.bf16.mxu0 %v1269_v0 }
  0x65   :  { %1112 = vmatpush3.bf16.msra.mxu1 %v1111_v13  ;;  %1184 = vmatpush3.bf16.msra.mxu0 %v1346_v27  ;;  %v1123_v27 = vpack.c.bf16 %v1513_v2, %v1508_v47 }
  0x66   :  { %1113 = vmatprep.subr.bf16.mxu1 %v1269_v0  ;;  %1185 = vmatprep.subr.bf16.mxu0 %v1269_v0 }
  0x69   :  { %1115 = vmatpush3.bf16.msra.mxu1 %v1114_v1  ;;  %1187 = vmatpush3.bf16.msra.mxu0 %v1368_v34 }
  0x6a   :  { %1116 = vmatprep.subr.bf16.mxu1 %v1269_v0  ;;  %1188 = vmatprep.subr.bf16.mxu0 %v1269_v0 }
  0x6d   :  { %1118 = vmatpush3.bf16.msra.mxu1 %v1117_v14  ;;  %1190 = vmatpush3.bf16.msra.mxu0 %v1396_v45 }
  0x6e   :  { %1119 = vmatprep.subr.bf16.mxu1 %v1269_v0  ;;  %1191 = vmatprep.subr.bf16.mxu0 %v1269_v0 }
  0x71   :  { %1121 = vmatpush3.bf16.msra.mxu1 %v1120_v20  ;;  %1193 = vmatpush3.bf16.msra.mxu0 %v1420_v56 }
  0x72   :  { %1122 = vmatprep.subr.bf16.mxu1 %v1269_v0  ;;  %1194 = vmatprep.subr.bf16.mxu0 %v1269_v0 }
  0x75   :  { %1124 = vmatpush3.bf16.msra.mxu1 %v1123_v27  ;;  %1196 = vmatpush3.bf16.msra.mxu0 %v1445_v6 }
  0x78   :  { %946 = vmatmul.mubr.f32.vlgmr.msra.gmra.mrb[0].mxu1 %v1385_v42  ;;  %1051 = vmatmul.mubr.msk.f32.vlgmr.msra.gmra.mrb[0].mxu0 %vm60_vm1, %v1273_v59 }
  0xa3   :  { %v716_v33 = vpop.permute.xlu0 %715 }
  0xa4   :  { %1216 = vrcp.f32 %v716_v33 }
  0xae   :  { %v1217_v34 = vpop.eup %1216 }
 0x14b   :  { %v406_v41 = vpop.f32.mrb[0].mxu1  ;;  %v701_v44 = vpop.f32.mrb[0].mxu0 }
 0x14c   :  { %v1197_v45 = vadd.f32 %v701_v44, %v406_v41  ;;  %v947_v50 = vpop.f32.mrb[1].mxu1  ;;  %v1052_v52 = vpop.f32.mrb[1].mxu0 }
 0x14e   :  { %v719_v0 = vmul.f32 %v1217_v34, %v1197_v45 }
 0x150   :  { %720 = vst [vmem:[#allocation6] sm:$0xff] %v719_v0 }
 0x151   :  { %1251 = shalt.err (!%p1248_p12)
}
 0x152   :  { %s1252_s5 = scalar_lea.hbm %s1604_s3, 128 }
 0x153   :  { %p1253_p13 = scmp.ne.s32.totalorder %s1604_s3, %s1252_s5  ;;  %p1256_p0 = scmp.lt.u32.totalorder %s1252_s5, %s1604_s3 }
 0x155   :  { %p1258_p1 = pnand %p1256_p0, %p1253_p13 }
 0x157   :  { %1261 = shalt.err (!%p1258_p1)
}
 0x158   :  { %730 = dma.vmem_to_hbm [thread:$0]  %s728_s28, 128, %s1604_s3, [#allocation5]  }
 0x159   :  { %1264 = dma.done.wait [#allocation5], 128  }
 0x15a   :  { %1265 = vsyncadd [#allocation5], 4294967168 }
 0x15b   :  { %734 = vsyncpa [#allocation4], 1 }
 0x15c   :  { %735 = vsyncpa [#allocation5], 1 }

</bundles_post_ra>
